<compile_context>
chip_gen: v6e
topology: v6e:2x2x1
jax: 0.10.0
libtpu: 0.0.40
codegen_flags: <defaults>
</compile_context>

<pallas_src>
import functools

import jax
import jax.numpy as jnp
import numpy as np
from jax.experimental import pallas as pl
from jax.experimental.pallas import tpu as pltpu


NEG_BIG = -1e30     # softmax mask for padded action lanes: exp underflows to 0
MAX_TILE_B = 512    # batch-tile cap: amortises per-step overhead; f32
                    # intermediates at 512x256 are ~0.5 MiB each (VMEM-safe)


# --------------------------------------------------------------------------
# Kernel
# --------------------------------------------------------------------------
def actor_mlp_kernel(x_ref, w1_ref, b1_ref, w2_ref, b2_ref, w3_ref, b3_ref,
                     out_ref):
    """Fused Linear->ReLU->Linear->ReLU->Linear->Softmax on one batch tile."""
    # fc1 + ReLU  (bf16 matmul on the MXU, f32 accumulate / elementwise)
    x = x_ref[...].astype(jnp.bfloat16)
    h1 = jnp.dot(x, w1_ref[...], preferred_element_type=jnp.float32)
    h1 = jnp.maximum(h1 + b1_ref[...], 0.0)

    # fc2 + ReLU
    h2 = jnp.dot(h1.astype(jnp.bfloat16), w2_ref[...],
                 preferred_element_type=jnp.float32)
    h2 = jnp.maximum(h2 + b2_ref[...], 0.0)

    # fc3 logits; padded action lanes carry NEG_BIG bias -> probability 0.
    logits = jnp.dot(h2.astype(jnp.bfloat16), w3_ref[...],
                     preferred_element_type=jnp.float32) + b3_ref[...]

    # Numerically-stable softmax along the lane-dense action axis.
    m = jnp.max(logits, axis=-1, keepdims=True)
    e = jnp.exp(logits - m)
    denom = jnp.sum(e, axis=-1, keepdims=True)
    # Exact divide (not approx reciprocal): rows must sum to 1 so a downstream
    # Categorical cumulative-sum sampler is not biased toward the last action.
    out_ref[...] = e / denom


# --------------------------------------------------------------------------
# Tiling / wrappers
# --------------------------------------------------------------------------
def _round_up(x, m):
    return ((x + m - 1) // m) * m


def _cdiv(a, b):
    return -(-a // b)


def choose_tiling(batch, max_tile=MAX_TILE_B):
    """Balanced batch tiling: choose the grid first, then the tile.

    Returns (tile_b, b_pad, grid_n) with b_pad = grid_n * tile_b, tile_b a
    multiple of 8, and < 8 rows of padding per tile.  Whenever batch > 8 the
    grid is forced to be even and >= 2 so the 'parallel' batch axis shards
    across both TensorCores on v7x (harmless on single-TC v5e/v6e).
    """
    grid_n = max(1, _cdiv(batch, max_tile))
    if batch > 8:
        grid_n = _round_up(max(grid_n, 2), 2)
    tile_b = _round_up(_cdiv(batch, grid_n), 8)
    b_pad = grid_n * tile_b
    return tile_b, b_pad, grid_n


def _pallas_forward(state_padded, params, tile_b, grid_n):
    """pallas_call on an already batch-padded state. Returns (b_pad, n_pad)."""
    w1, b1, w2, b2, w3, b3 = params
    b_pad, input_dims = state_padded.shape
    fc1_dims = w1.shape[1]
    fc2_dims = w2.shape[1]
    n_pad = w3.shape[1]                      # action dim, lane-padded to 128

    # Advisory cost estimate so XLA schedules surrounding RL-loop ops sensibly.
    flops = 2 * b_pad * (input_dims * fc1_dims + fc1_dims * fc2_dims
                         + fc2_dims * n_pad)
    bytes_accessed = (b_pad * input_dims * 4
                      + (w1.size + w2.size + w3.size) * 2      # bf16 weights
                      + (b1.size + b2.size + b3.size) * 4
                      + b_pad * n_pad * 4)
    cost = pl.CostEstimate(flops=int(flops), transcendentals=int(b_pad * n_pad),
                           bytes_accessed=int(bytes_accessed))

    const = lambda i: (0, 0)     # weights/biases: same block every grid step
    return pl.pallas_call(
        actor_mlp_kernel,
        out_shape=jax.ShapeDtypeStruct((b_pad, n_pad), jnp.float32),
        grid=(grid_n,),
        in_specs=[
            pl.BlockSpec((tile_b, input_dims), lambda i: (i, 0)),   # state tile
            pl.BlockSpec((input_dims, fc1_dims), const),            # w1 (resident)
            pl.BlockSpec((1, fc1_dims), const),                     # b1
            pl.BlockSpec((fc1_dims, fc2_dims), const),              # w2 (resident)
            pl.BlockSpec((1, fc2_dims), const),                     # b2
            pl.BlockSpec((fc2_dims, n_pad), const),                 # w3 (resident)
            pl.BlockSpec((1, n_pad), const),                        # b3
        ],
        out_specs=pl.BlockSpec((tile_b, n_pad), lambda i: (i, 0)),
        compiler_params=pltpu.CompilerParams(
            dimension_semantics=("parallel",)),
        cost_estimate=cost,
    )(state_padded, w1, b1, w2, b2, w3, b3)


@jax.jit
def actor_forward_padded(state_padded, params):
    """Latency path: state pre-padded to (b_pad, input_dims) from choose_tiling.

    No pad/slice XLA ops per call; returns the padded (b_pad, n_pad) prob
    buffer (real probs at [:batch, :n_actions]).
    """
    b_pad = state_padded.shape[0]
    tile_b, b_check, grid_n = choose_tiling(b_pad)
    if b_check != b_pad:
        raise ValueError(
            f"state_padded batch ({b_pad}) must equal the b_pad produced by "
            f"choose_tiling (got {b_check}); pad the rollout buffer with "
            "choose_tiling() first.")
    return _pallas_forward(state_padded, params, tile_b, grid_n)


@functools.partial(jax.jit, static_argnames=("n_actions",))
def actor_forward(state, params, *, n_actions):
    """Convenience path: (batch, input_dims) -> (batch, n_actions) probs."""
    batch = state.shape[0]
    tile_b, b_pad, grid_n = choose_tiling(batch)
    if b_pad != batch:
        state = jnp.pad(state, ((0, b_pad - batch), (0, 0)))
    probs_padded = _pallas_forward(state, params, tile_b, grid_n)
    return probs_padded[:batch, :n_actions]


# --------------------------------------------------------------------------
# Params / reference
# --------------------------------------------------------------------------
def init_params(key, input_dims, fc1_dims, fc2_dims, n_actions):
    """nn.Linear-style U(-1/sqrt(fan_in), 1/sqrt(fan_in)) init.

    Weights stored (in, out) in bf16; biases f32. The action dim of w3/b3 is
    lane-padded to a multiple of 128 with zero weights and NEG_BIG bias so the
    padded lanes get exactly 0 probability.
    """
    def linear(key, fan_in, fan_out):
        kw, kb = jax.random.split(key)
        bound = 1.0 / np.sqrt(fan_in)
        w = jax.random.uniform(kw, (fan_in, fan_out), jnp.float32,
                               minval=-bound, maxval=bound)
        b = jax.random.uniform(kb, (1, fan_out), jnp.float32,
                               minval=-bound, maxval=bound)
        return w, b

    k1, k2, k3 = jax.random.split(key, 3)
    w1, b1 = linear(k1, input_dims, fc1_dims)
    w2, b2 = linear(k2, fc1_dims, fc2_dims)
    w3, b3 = linear(k3, fc2_dims, n_actions)

    n_pad = _round_up(max(n_actions, 128), 128)
    if n_pad != n_actions:
        w3 = jnp.pad(w3, ((0, 0), (0, n_pad - n_actions)))
        b3 = jnp.concatenate(
            [b3, jnp.full((1, n_pad - n_actions), NEG_BIG, jnp.float32)],
            axis=-1)

    return (w1.astype(jnp.bfloat16), b1,
            w2.astype(jnp.bfloat16), b2,
            w3.astype(jnp.bfloat16), b3)


def reference_forward(state, params, n_actions):
    """Pure-JAX reference using the same bf16 weights / f32 accumulation."""
    w1, b1, w2, b2, w3, b3 = params
    x = state.astype(jnp.bfloat16)
    h1 = jnp.maximum(
        jnp.dot(x, w1, preferred_element_type=jnp.float32) + b1, 0.0)
    h2 = jnp.maximum(
        jnp.dot(h1.astype(jnp.bfloat16), w2,
                preferred_element_type=jnp.float32) + b2, 0.0)
    logits = jnp.dot(h2.astype(jnp.bfloat16), w3,
                     preferred_element_type=jnp.float32) + b3
    return jax.nn.softmax(logits, axis=-1)[:, :n_actions]


# --------------------------------------------------------------------------
# Demo / self-test
# --------------------------------------------------------------------------
if __name__ == "__main__":
    # Small shapes consistent with the module: observation-vector inputs.
    batch = 2
    input_dims = 8       # *input_dims in the PyTorch ctor (observation size)
    fc1_dims = 256
    fc2_dims = 256
    n_actions = 4

    key = jax.random.PRNGKey(0)
    k_params, k_state, k_state2 = jax.random.split(key, 3)

    params = init_params(k_params, input_dims, fc1_dims, fc2_dims, n_actions)
    state = jax.random.normal(k_state, (batch, input_dims), jnp.float32)

    # 1) Convenience path (pads + slices around the kernel).
    probs = jax.block_until_ready(
        actor_forward(state, params, n_actions=n_actions))
    ref = reference_forward(state, params, n_actions)
    np.testing.assert_allclose(np.asarray(probs), np.asarray(ref),
                               rtol=2e-3, atol=2e-3)
    np.testing.assert_allclose(np.asarray(probs).sum(axis=-1), 1.0,
                               rtol=1e-5, atol=1e-5)   # exact-divide softmax

    # 2) Latency path: pre-padded rollout buffer, no pad/slice ops per step.
    _, b_pad, _ = choose_tiling(batch)
    state_padded = jnp.zeros((b_pad, input_dims), jnp.float32).at[:batch].set(state)
    probs_pad = jax.block_until_ready(actor_forward_padded(state_padded, params))
    np.testing.assert_allclose(np.asarray(probs_pad[:batch, :n_actions]),
                               np.asarray(ref), rtol=2e-3, atol=2e-3)

    # 3) Multi-tile path (grid forced to 2 balanced tiles; padded rows sliced).
    batch2 = 40
    state2 = jax.random.normal(k_state2, (batch2, input_dims), jnp.float32)
    probs2 = jax.block_until_ready(
        actor_forward(state2, params, n_actions=n_actions))
    ref2 = reference_forward(state2, params, n_actions)
    np.testing.assert_allclose(np.asarray(probs2), np.asarray(ref2),
                               rtol=2e-3, atol=2e-3)

    # TODO(synk): torch.distributions.Categorical construction (sampling,
    # log_prob) and the Adam optimizer / checkpoint I/O are host-side glue,
    # not kernel compute; only the probability vector is produced here.
    print("KERNEL_OK")
</pallas_src>

<mosaic_0001>
module attributes {stable_mosaic.version = 11 : i64} {
  func.func @actor_mlp_kernel(%arg0: i32, %arg1: memref<8x8xf32, #tpu.memory_space<vmem>>, %arg2: memref<8x256xbf16, #tpu.memory_space<vmem>>, %arg3: memref<1x256xf32, #tpu.memory_space<vmem>>, %arg4: memref<256x256xbf16, #tpu.memory_space<vmem>>, %arg5: memref<1x256xf32, #tpu.memory_space<vmem>>, %arg6: memref<256x128xbf16, #tpu.memory_space<vmem>>, %arg7: memref<1x128xf32, #tpu.memory_space<vmem>>, %arg8: memref<8x128xf32, #tpu.memory_space<vmem>>) attributes {dimension_semantics = [#tpu.dimension_semantics<parallel>], iteration_bounds = array<i64: 1>, scalar_prefetch = 0 : i64, scratch_operands = 0 : i64, tpu.core_type = #tpu.core_type<tc>, window_params = [{transform_indices = @transform_0, window_bounds = array<i64: 8, 8>}, {pipeline_mode = #tpu.pipeline_mode<synchronous>, transform_indices = @transform_1, window_bounds = array<i64: 8, 256>}, {pipeline_mode = #tpu.pipeline_mode<synchronous>, transform_indices = @transform_2, window_bounds = array<i64: 1, 256>}, {pipeline_mode = #tpu.pipeline_mode<synchronous>, transform_indices = @transform_3, window_bounds = array<i64: 256, 256>}, {pipeline_mode = #tpu.pipeline_mode<synchronous>, transform_indices = @transform_4, window_bounds = array<i64: 1, 256>}, {pipeline_mode = #tpu.pipeline_mode<synchronous>, transform_indices = @transform_5, window_bounds = array<i64: 256, 128>}, {pipeline_mode = #tpu.pipeline_mode<synchronous>, transform_indices = @transform_6, window_bounds = array<i64: 1, 128>}, {transform_indices = @transform_7, window_bounds = array<i64: 8, 128>}]} {
    %c0 = arith.constant 0 : index
    %c0_0 = arith.constant 0 : index
    %0 = vector.load %arg1[%c0, %c0_0] : memref<8x8xf32, #tpu.memory_space<vmem>>, vector<8x8xf32>
    %1 = arith.truncf %0 : vector<8x8xf32> to vector<8x8xbf16>
    %c0_1 = arith.constant 0 : index
    %c0_2 = arith.constant 0 : index
    %2 = vector.load %arg2[%c0_1, %c0_2] : memref<8x256xbf16, #tpu.memory_space<vmem>>, vector<8x256xbf16>
    %cst = arith.constant dense<0.000000e+00> : vector<8x256xf32>
    %3 = tpu.matmul %1, %2, %cst {dimension_numbers = #tpu.dot_dimension_numbers<[1], [0], [0], [1], [0, 0, 1, 1], [], []>} : vector<8x8xbf16>, vector<8x256xbf16>, vector<8x256xf32> -> vector<8x256xf32>
    %c0_3 = arith.constant 0 : index
    %c0_4 = arith.constant 0 : index
    %4 = vector.load %arg3[%c0_3, %c0_4] : memref<1x256xf32, #tpu.memory_space<vmem>>, vector<1x256xf32>
    %5 = vector.broadcast %4 : vector<1x256xf32> to vector<8x256xf32>
    %6 = arith.addf %3, %5 : vector<8x256xf32>
    %cst_5 = arith.constant 0.000000e+00 : f32
    %7 = vector.broadcast %cst_5 : f32 to vector<8x256xf32>
    %8 = arith.maximumf %6, %7 : vector<8x256xf32>
    %9 = arith.truncf %8 : vector<8x256xf32> to vector<8x256xbf16>
    %c0_6 = arith.constant 0 : index
    %c0_7 = arith.constant 0 : index
    %10 = vector.load %arg4[%c0_6, %c0_7] : memref<256x256xbf16, #tpu.memory_space<vmem>>, vector<256x256xbf16>
    %cst_8 = arith.constant dense<0.000000e+00> : vector<8x256xf32>
    %11 = tpu.matmul %9, %10, %cst_8 {dimension_numbers = #tpu.dot_dimension_numbers<[1], [0], [0], [1], [0, 0, 1, 1], [], []>} : vector<8x256xbf16>, vector<256x256xbf16>, vector<8x256xf32> -> vector<8x256xf32>
    %c0_9 = arith.constant 0 : index
    %c0_10 = arith.constant 0 : index
    %12 = vector.load %arg5[%c0_9, %c0_10] : memref<1x256xf32, #tpu.memory_space<vmem>>, vector<1x256xf32>
    %13 = vector.broadcast %12 : vector<1x256xf32> to vector<8x256xf32>
    %14 = arith.addf %11, %13 : vector<8x256xf32>
    %cst_11 = arith.constant 0.000000e+00 : f32
    %15 = vector.broadcast %cst_11 : f32 to vector<8x256xf32>
    %16 = arith.maximumf %14, %15 : vector<8x256xf32>
    %17 = arith.truncf %16 : vector<8x256xf32> to vector<8x256xbf16>
    %c0_12 = arith.constant 0 : index
    %c0_13 = arith.constant 0 : index
    %18 = vector.load %arg6[%c0_12, %c0_13] : memref<256x128xbf16, #tpu.memory_space<vmem>>, vector<256x128xbf16>
    %cst_14 = arith.constant dense<0.000000e+00> : vector<8x128xf32>
    %19 = tpu.matmul %17, %18, %cst_14 {dimension_numbers = #tpu.dot_dimension_numbers<[1], [0], [0], [1], [0, 0, 1, 1], [], []>} : vector<8x256xbf16>, vector<256x128xbf16>, vector<8x128xf32> -> vector<8x128xf32>
    %c0_15 = arith.constant 0 : index
    %c0_16 = arith.constant 0 : index
    %20 = vector.load %arg7[%c0_15, %c0_16] : memref<1x128xf32, #tpu.memory_space<vmem>>, vector<1x128xf32>
    %21 = vector.broadcast %20 : vector<1x128xf32> to vector<8x128xf32>
    %22 = arith.addf %19, %21 : vector<8x128xf32>
    %cst_17 = arith.constant dense<0xFF800000> : vector<8xf32>
    %23 = vector.multi_reduction <maximumf>, %22, %cst_17 [1] : vector<8x128xf32> to vector<8xf32>
    %24 = vector.shape_cast %23 : vector<8xf32> to vector<8x1xf32>
    %25 = vector.broadcast %24 : vector<8x1xf32> to vector<8x128xf32>
    %26 = arith.subf %22, %25 : vector<8x128xf32>
    %27 = math.exp %26 : vector<8x128xf32>
    %cst_18 = arith.constant dense<0.000000e+00> : vector<8xf32>
    %28 = vector.multi_reduction <add>, %27, %cst_18 [1] : vector<8x128xf32> to vector<8xf32>
    %29 = vector.shape_cast %28 : vector<8xf32> to vector<8x1xf32>
    %30 = vector.broadcast %29 : vector<8x1xf32> to vector<8x128xf32>
    %31 = arith.divf %27, %30 : vector<8x128xf32>
    %c0_19 = arith.constant 0 : index
    %c0_20 = arith.constant 0 : index
    %32 = vector.load %arg8[%c0_19, %c0_20] : memref<8x128xf32, #tpu.memory_space<vmem>>, vector<8x128xf32>
    tpu.vector_store %arg8[%c0_19, %c0_20], %31 {strides = array<i32>} : memref<8x128xf32, #tpu.memory_space<vmem>>, vector<8x128xf32>,
    return
  }
  func.func @transform_0(%arg0: i32) -> (i32, i32) {
    %c0_i32 = arith.constant 0 : i32
    %c0_i32_0 = arith.constant 0 : i32
    return %arg0, %c0_i32 : i32, i32
  }
  func.func @transform_1(%arg0: i32) -> (i32, i32) {
    %c0_i32 = arith.constant 0 : i32
    %c0_i32_0 = arith.constant 0 : i32
    %c0_i32_1 = arith.constant 0 : i32
    return %c0_i32, %c0_i32_0 : i32, i32
  }
  func.func @transform_2(%arg0: i32) -> (i32, i32) {
    %c0_i32 = arith.constant 0 : i32
    %c0_i32_0 = arith.constant 0 : i32
    %c0_i32_1 = arith.constant 0 : i32
    return %c0_i32, %c0_i32_0 : i32, i32
  }
  func.func @transform_3(%arg0: i32) -> (i32, i32) {
    %c0_i32 = arith.constant 0 : i32
    %c0_i32_0 = arith.constant 0 : i32
    %c0_i32_1 = arith.constant 0 : i32
    return %c0_i32, %c0_i32_0 : i32, i32
  }
  func.func @transform_4(%arg0: i32) -> (i32, i32) {
    %c0_i32 = arith.constant 0 : i32
    %c0_i32_0 = arith.constant 0 : i32
    %c0_i32_1 = arith.constant 0 : i32
    return %c0_i32, %c0_i32_0 : i32, i32
  }
  func.func @transform_5(%arg0: i32) -> (i32, i32) {
    %c0_i32 = arith.constant 0 : i32
    %c0_i32_0 = arith.constant 0 : i32
    %c0_i32_1 = arith.constant 0 : i32
    return %c0_i32, %c0_i32_0 : i32, i32
  }
  func.func @transform_6(%arg0: i32) -> (i32, i32) {
    %c0_i32 = arith.constant 0 : i32
    %c0_i32_0 = arith.constant 0 : i32
    %c0_i32_1 = arith.constant 0 : i32
    return %c0_i32, %c0_i32_0 : i32, i32
  }
  func.func @transform_7(%arg0: i32) -> (i32, i32) {
    %c0_i32 = arith.constant 0 : i32
    %c0_i32_0 = arith.constant 0 : i32
    return %arg0, %c0_i32 : i32, i32
  }
}

</mosaic_0001>

<bundles_post_ra>
// kernel: actor_forward.1
= control target key start
LH: loop header
LB: loop body
LE: loop exit
PB: predicated region body
PF: predicated region fallthrough
CT: control target
= control target key end

     0   :  { %12 = vsyncpa [#allocation3], 0  ;;  %s838_s0 = inlined_call_operand.vmem [shape: f32[8,8], index: 0, kind: input, shape index: {}]   ;;  %s839_s1 = inlined_call_operand.vmem [shape: bf16[8,256], index: 1, kind: input, shape index: {}]   ;;  %s840_s2 = inlined_call_operand.vmem [shape: f32[1,256], index: 2, kind: input, shape index: {}]   ;;  %s841_s3 = inlined_call_operand.hbm [shape: bf16[256,256], index: 3, kind: input, shape index: {}]   ;;  %s842_s4 = inlined_call_operand.vmem [shape: f32[1,256], index: 4, kind: input, shape index: {}]   ;;  %s843_s5 = inlined_call_operand.hbm [shape: bf16[256,128], index: 5, kind: input, shape index: {}]   ;;  %s844_s6 = inlined_call_operand.vmem [shape: f32[1,128], index: 6, kind: input, shape index: {}]   ;;  %s845_s7 = inlined_call_operand.vmem [shape: f32[8,128], index: 7, kind: output, shape index: {}]  }
   0x1   :  { %13 = vsyncpa [#allocation5], 0  ;;  %s767_s24 = smov [#allocation2]  }
   0x2   :  { %s25_s25 = sshll.u32 %s767_s24, 4  ;;  %s26_s25 = int_to_ptr.vmem [resolvable:$true] %s25_s25 }
   0x3   :  { %s731_s26 = scalar_lea.vmem %s26_s25, 4096  ;;  %p736_p1 = scmp.lt.s32.totalorder %s26_s25, %s26_s25 }
   0x4   :  { %p732_p0 = scmp.ne.s32.totalorder %s26_s25, %s731_s26  ;;  %p737_p2 = scmp.lt.s32.totalorder %s731_s26, %s731_s26 }
   0x6   :  { %p738_p3 = por %p737_p2, %p736_p1 }
   0x8   :  { %p739_p4 = pnand %p738_p3, %p732_p0 }
   0xa   :  { %742 = shalt.err (!%p739_p4)
}
   0xb   :  { %s768_s27 = smov 128   ;;  %s769_s28 = smov 8  }
   0xc   :  { %31 = dma.hbm_to_vmem [thread:$0]  %s841_s3, 4096, %s26_s25, [#allocation3], %s768_s27, %s768_s27, %s769_s28  }
   0xd   :  { %s770_s8 = smov [#allocation4]  }
   0xe   :  { %s39_s9 = sshll.u32 %s770_s8, 4  ;;  %s40_s9 = int_to_ptr.vmem [resolvable:$true] %s39_s9 }
   0xf   :  { %s751_s10 = scalar_lea.vmem %s40_s9, 2048  ;;  %p756_p6 = scmp.lt.s32.totalorder %s40_s9, %s40_s9 }
  0x10   :  { %p752_p5 = scmp.ne.s32.totalorder %s40_s9, %s751_s10  ;;  %p757_p7 = scmp.lt.s32.totalorder %s751_s10, %s751_s10 }
  0x12   :  { %p758_p8 = por %p757_p7, %p756_p6 }
  0x14   :  { %p759_p9 = pnand %p758_p8, %p752_p5 }
  0x16   :  { %762 = shalt.err (!%p759_p9)
}
  0x17   :  { %s771_s11 = smov 64   ;;  %s772_s12 = smov 4  }
  0x18   :  { %45 = dma.hbm_to_vmem [thread:$0]  %s843_s5, 2048, %s40_s9, [#allocation5], %s771_s11, %s771_s11, %s772_s12  }
  0x19   :  { %763 = dma.done.wait [#allocation3], 4096  }
  0x1a   :  { %764 = vsyncadd [#allocation3], 4294963200 }
  0x1b   :  { %765 = dma.done.wait [#allocation5], 2048  }
  0x1c   :  { %766 = vsyncadd [#allocation5], 4294965248  ;;  %v773_v0 = vmov 0   ;;  %v57_v1 = vld [vmem:[%s839_s1] sm:$0xff]  ;;  %vm79_vm0 = vcmask 1043456   ;;  %vm75_vm1 = vcmask 64512   ;;  %v60_v51 = vlaneseq }
  0x1d   :  { %118 = vmatprep.mubr.bf16.mxu0 %v773_v0  ;;  %v55_v2 = vld [vmem:[%s838_s0] sm:$0xff]  ;;  %v572_v3 = vcombine.high %v57_v1, %v57_v1  ;;  %v571_v4 = vcombine.low %v57_v1, %v57_v1  ;;  %v655_v5 = vld [vmem:[#allocation2 + $0x74] ss:$8 sps:$4 sm:$0xff]   ;;  %v657_v6 = vld [vmem:[#allocation2 + $0x70] ss:$8 sps:$4 sm:$0xff]  }
  0x1e   :  { %v658_v7 = vld [vmem:[#allocation2 + $0x64] ss:$8 sps:$4 sm:$0xff]   ;;  %v56_v9 = vpack.c.bf16 %v55_v2, %v55_v2  ;;  %335 = vmatprep.subr.bf16.mxu1 %v655_v5  ;;  %v660_v10 = vld [vmem:[#allocation2 + $0x60] ss:$8 sps:$4 sm:$0xff]   ;;  %v661_v11 = vld [vmem:[#allocation2 + $0x54] ss:$8 sps:$4 sm:$0xff]  }
  0x1f   :  { %573 = vmatprep.subr.msk.bf16.mxu0 %vm79_vm0, %v572_v3  ;;  %v81_v8 = vsel %vm79_vm0, %v571_v4, 0  ;;  %336 = vmatpush1.bf16.msra.mxu1 %v657_v6  ;;  %v663_v12 = vld [vmem:[#allocation2 + $0x50] ss:$8 sps:$4 sm:$0xff]   ;;  %v664_v13 = vld [vmem:[#allocation2 + $0x44] ss:$8 sps:$4 sm:$0xff]   ;;  %v61_v52 = vshrl.u32 %v60_v51, 7 }
  0x20   :  { %101 = vmatpush1.bf16.msra.mxu0 %v81_v8  ;;  %337 = vmatprep.subr.bf16.mxu1 %v658_v7  ;;  %v666_v14 = vld [vmem:[#allocation2 + $0x40] ss:$8 sps:$4 sm:$0xff]   ;;  %v667_v15 = vld [vmem:[#allocation2 + $0x34] ss:$8 sps:$4 sm:$0xff]   ;;  %v669_v16 = vld [vmem:[#allocation2 + $0x30] ss:$8 sps:$4 sm:$0xff]  }
  0x21   :  { %v670_v17 = vld [vmem:[#allocation2 + $0x24] ss:$8 sps:$4 sm:$0xff]   ;;  %v672_v18 = vld [vmem:[#allocation2 + $0x20] ss:$8 sps:$4 sm:$0xff]   ;;  %v673_v19 = vld [vmem:[#allocation2 + $0x14] ss:$8 sps:$4 sm:$0xff]  }
  0x22   :  { %v675_v20 = vld [vmem:[#allocation2 + $0x10] ss:$8 sps:$4 sm:$0xff]   ;;  %v676_v21 = vld [vmem:[#allocation2 + $0x4] ss:$8 sps:$4 sm:$0xff]   ;;  %v678_v22 = vld [vmem:[#allocation2] ss:$8 sps:$4 sm:$0xff]  }
  0x23   :  { %574 = vmatmul.mubr.msk.bf16.vlgmr.msra.gmra.mxu0 %vm75_vm1, %v56_v9  ;;  %338 = vmatpush1.bf16.msra.mxu1 %v660_v10  ;;  %v679_v23 = vld [vmem:[#allocation2 + $0xf4] ss:$8 sps:$4 sm:$0xff]   ;;  %v681_v24 = vld [vmem:[#allocation2 + $0xf0] ss:$8 sps:$4 sm:$0xff]   ;;  %v682_v25 = vld [vmem:[#allocation2 + $0xe4] ss:$8 sps:$4 sm:$0xff]  }
  0x24   :  { %339 = vmatprep.subr.bf16.mxu1 %v661_v11  ;;  %v684_v26 = vld [vmem:[#allocation2 + $0xe0] ss:$8 sps:$4 sm:$0xff]   ;;  %v685_v27 = vld [vmem:[#allocation2 + $0xd4] ss:$8 sps:$4 sm:$0xff]   ;;  %v687_v28 = vld [vmem:[#allocation2 + $0xd0] ss:$8 sps:$4 sm:$0xff]  }
  0x25   :  { %v688_v29 = vld [vmem:[#allocation2 + $0xc4] ss:$8 sps:$4 sm:$0xff]   ;;  %v690_v30 = vld [vmem:[#allocation2 + $0xc0] ss:$8 sps:$4 sm:$0xff]   ;;  %v691_v31 = vld [vmem:[#allocation2 + $0xb4] ss:$8 sps:$4 sm:$0xff]  }
  0x26   :  { %v693_v32 = vld [vmem:[#allocation2 + $0xb0] ss:$8 sps:$4 sm:$0xff]   ;;  %v694_v33 = vld [vmem:[#allocation2 + $0xa4] ss:$8 sps:$4 sm:$0xff]   ;;  %v696_v34 = vld [vmem:[#allocation2 + $0xa0] ss:$8 sps:$4 sm:$0xff]  }
  0x27   :  { %340 = vmatpush1.bf16.msra.mxu1 %v663_v12  ;;  %v697_v35 = vld [vmem:[#allocation2 + $0x94] ss:$8 sps:$4 sm:$0xff]   ;;  %v699_v36 = vld [vmem:[#allocation2 + $0x90] ss:$8 sps:$4 sm:$0xff]   ;;  %v700_v37 = vld [vmem:[#allocation2 + $0x84] ss:$8 sps:$4 sm:$0xff]  }
  0x28   :  { %341 = vmatprep.subr.bf16.mxu1 %v664_v13  ;;  %v702_v38 = vld [vmem:[#allocation2 + $0x80] ss:$8 sps:$4 sm:$0xff]   ;;  %v703_v39 = vld [vmem:[#allocation4 + $0x78] sm:$0xff]   ;;  %v705_v41 = vld [vmem:[#allocation4 + $0x70] sm:$0xff]   ;;  %v62_v53 = vsub.s32 0, %v61_v52  ;;  %v66_v55 = vsub.s32 1, %v61_v52 }
  0x29   :  { %v704_v40 = vld [vmem:[#allocation4 + $0x38] sm:$0xff]   ;;  %624 = vmatprep.subr.bf16.mxu0 %v703_v39  ;;  %v706_v42 = vld [vmem:[#allocation4 + $0x30] sm:$0xff]   ;;  %v707_v43 = vld [vmem:[#allocation4 + $0x68] sm:$0xff]  }
  0x2a   :  { %625 = vmatpush3.bf16.msra.mxu0 %v704_v40  ;;  %v708_v44 = vld [vmem:[#allocation4 + $0x28] sm:$0xff]   ;;  %v709_v45 = vld [vmem:[#allocation4 + $0x60] sm:$0xff]   ;;  %v711_v47 = vld [vmem:[#allocation4 + $0x58] sm:$0xff]  }
  0x2b   :  { %342 = vmatpush1.bf16.msra.mxu1 %v666_v14  ;;  %626 = vmatprep.subr.bf16.mxu0 %v705_v41  ;;  %v710_v46 = vld [vmem:[#allocation4 + $0x20] sm:$0xff]   ;;  %v712_v48 = vld [vmem:[#allocation4 + $0x18] sm:$0xff]   ;;  %v713_v49 = vld [vmem:[#allocation4 + $0x50] sm:$0xff]  }
  0x2c   :  { %343 = vmatprep.subr.bf16.mxu1 %v667_v15  ;;  %v714_v50 = vld [vmem:[#allocation4 + $0x10] sm:$0xff]   ;;  %v58_v54 = vld [vmem:[%s840_s2] sm:$0x3]  ;;  %v715_v4 = vld [vmem:[#allocation4 + $0x48] sm:$0xff]  }
  0x2d   :  { %v63_v56 = vrot.slane %v58_v54, %v62_v53  ;;  %v67_v57 = vrot.slane %v58_v54, %v66_v55  ;;  %v716_v5 = vld [vmem:[#allocation4 + $0x8] sm:$0xff]   ;;  %v717_v6 = vld [vmem:[#allocation4 + $0x40] sm:$0xff]  }
  0x2e   :  { %627 = vmatpush3.bf16.msra.mxu0 %v706_v42  ;;  %v718_v7 = vld [vmem:[#allocation4] sm:$0xff]  }
  0x2f   :  { %344 = vmatpush1.bf16.msra.mxu1 %v669_v16  ;;  %628 = vmatprep.subr.bf16.mxu0 %v707_v43  ;;  %v163_v8 = vld [vmem:[%s842_s4] sm:$0x3] }
  0x30   :  { %345 = vmatprep.subr.bf16.mxu1 %v670_v17  ;;  %v168_v9 = vrot.slane %v163_v8, %v62_v53  ;;  %v172_v10 = vrot.slane %v163_v8, %v66_v55 }
  0x32   :  { %629 = vmatpush3.bf16.msra.mxu0 %v708_v44 }
  0x33   :  { %346 = vmatpush1.bf16.msra.mxu1 %v672_v18  ;;  %630 = vmatprep.subr.bf16.mxu0 %v709_v45 }
  0x34   :  { %347 = vmatprep.subr.bf16.mxu1 %v673_v19 }
  0x36   :  { %631 = vmatpush3.bf16.msra.mxu0 %v710_v46 }
  0x37   :  { %348 = vmatpush1.bf16.msra.mxu1 %v675_v20  ;;  %632 = vmatprep.subr.bf16.mxu0 %v711_v47 }
  0x38   :  { %349 = vmatprep.subr.bf16.mxu1 %v676_v21 }
  0x3a   :  { %633 = vmatpush3.bf16.msra.mxu0 %v712_v48 }
  0x3b   :  { %350 = vmatpush1.bf16.msra.mxu1 %v678_v22  ;;  %634 = vmatprep.subr.bf16.mxu0 %v713_v49 }
  0x3c   :  { %351 = vmatprep.subr.bf16.mxu1 %v679_v23  ;;  %v607_v23 = vld [vmem:[%s844_s6] ss:$0 sm:$0xff] }
  0x3e   :  { %635 = vmatpush3.bf16.msra.mxu0 %v714_v50 }
  0x3f   :  { %352 = vmatpush2.bf16.msra.mxu1 %v681_v24  ;;  %636 = vmatprep.subr.bf16.mxu0 %v715_v4 }
  0x40   :  { %353 = vmatprep.subr.bf16.mxu1 %v682_v25 }
  0x42   :  { %637 = vmatpush3.bf16.msra.mxu0 %v716_v5 }
  0x43   :  { %354 = vmatpush2.bf16.msra.mxu1 %v684_v26  ;;  %638 = vmatprep.subr.bf16.mxu0 %v717_v6 }
  0x44   :  { %355 = vmatprep.subr.bf16.mxu1 %v685_v27 }
  0x46   :  { %639 = vmatpush3.bf16.msra.mxu0 %v718_v7 }
  0x47   :  { %356 = vmatpush2.bf16.msra.mxu1 %v687_v28 }
  0x48   :  { %357 = vmatprep.subr.bf16.mxu1 %v688_v29 }
  0x4b   :  { %358 = vmatpush2.bf16.msra.mxu1 %v690_v30 }
  0x4c   :  { %359 = vmatprep.subr.bf16.mxu1 %v691_v31 }
  0x4f   :  { %360 = vmatpush2.bf16.msra.mxu1 %v693_v32 }
  0x50   :  { %361 = vmatprep.subr.bf16.mxu1 %v694_v33 }
  0x53   :  { %362 = vmatpush2.bf16.msra.mxu1 %v696_v34 }
  0x54   :  { %363 = vmatprep.subr.bf16.mxu1 %v697_v35 }
  0x57   :  { %364 = vmatpush2.bf16.msra.mxu1 %v699_v36 }
  0x58   :  { %365 = vmatprep.subr.bf16.mxu1 %v700_v37 }
  0x5b   :  { %366 = vmatpush2.bf16.msra.mxu1 %v702_v38 }
  0xe3   :  { %v120_v58 = vpop.f32.mrf.mxu0 }
  0xe4   :  { %v121_v59 = vadd.f32 %v120_v58, %v63_v56 }
  0xe5   :  { %v122_v60 = vpop.f32.mrf.mxu0 }
  0xe6   :  { %v123_v61 = vadd.f32 %v122_v60, %v67_v57  ;;  %v127_v62 = vmax.f32 %v121_v59, 0.0 }
  0xe7   :  { %v124_v63 = vpop.f32.mrf.mxu0 }
  0xe8   :  { %v128_v0 = vmax.f32 %v123_v61, 0.0  ;;  %v129_v3 = vpack.c.bf16 %v127_v62, %v127_v62 }
  0xe9   :  { %v125_v1 = vpop.f32.mrf.mxu0 }
  0xea   :  { %v130_v2 = vpack.c.bf16 %v128_v0, %v128_v0 }
  0xec   :  { %367 = vmatprep.mubr.bf16.mxu1 %v130_v2 }
  0xed   :  { %368 = vmatmul.mubr.bf16.vlgmr.msra.gmra.mxu1 %v129_v3 }
 0x1ad   :  { %v369_v11 = vpop.f32.mrf.mxu1 }
 0x1ae   :  { %v370_v12 = vadd.f32 %v369_v11, %v168_v9 }
 0x1af   :  { %v371_v13 = vpop.f32.mrf.mxu1 }
 0x1b0   :  { %v372_v14 = vadd.f32 %v371_v13, %v172_v10  ;;  %v376_v15 = vmax.f32 %v370_v12, 0.0 }
 0x1b1   :  { %v373_v16 = vpop.f32.mrf.mxu1 }
 0x1b2   :  { %v377_v17 = vmax.f32 %v372_v14, 0.0  ;;  %v378_v20 = vpack.c.bf16 %v376_v15, %v376_v15 }
 0x1b3   :  { %v374_v18 = vpop.f32.mrf.mxu1 }
 0x1b4   :  { %v379_v19 = vpack.c.bf16 %v377_v17, %v377_v17 }
 0x1b6   :  { %547 = vmatprep.mubr.bf16.mxu0 %v379_v19 }
 0x1b7   :  { %548 = vmatmul.mubr.bf16.vlgmr.msra.gmra.mxu0 %v378_v20 }
 0x277   :  { %v640_v21 = vpop.f32.mrf.mxu0 }
 0x279   :  { %v641_v22 = vpop.f32.mrf.mxu0 }
 0x27a   :  { %v642_v24 = vadd.f32 %v641_v22, %v640_v21 }
 0x27b   :  { %v643_v25 = vpop.f32.mrf.mxu0 }
 0x27c   :  { %v550_v26 = vadd.f32 %v642_v24, %v607_v23 }
 0x27d   :  { %v644_v27 = vpop.f32.mrf.mxu0 }
 0x27e   :  { %555 = vmax.xlane.f32.xlu0 %v550_v26 }
 0x307   :  { %v556_v28 = vpop.xlane.xlu0 %555 }
 0x308   :  { %v557_v29 = vsub.f32 %v550_v26, %v556_v28 }
 0x30a   :  { %v558_v30 = vmul.f32 1.442695, %v557_v29 }
 0x30c   :  { %719 = vpow2.f32 %v558_v30 }
 0x319   :  { %v720_v31 = vpop.eup %719 }
 0x31a   :  { %560 = vadd.xlane.f32.xlu0 %v720_v31 }
 0x3a3   :  { %v561_v32 = vpop.xlane.xlu0 %560 }
 0x3a4   :  { %721 = vrcp.f32 %v561_v32 }
 0x3b1   :  { %v722_v33 = vpop.eup %721 }
 0x3b2   :  { %v563_v34 = vmul.f32 %v722_v33, %v720_v31 }
 0x3b4   :  { %564 = vst [vmem:[%s845_s7] sm:$0xff] %v563_v34 }
 0x3b5   :  { %569 = vsyncpa [#allocation3], 1 }
 0x3b6   :  { %570 = vsyncpa [#allocation5], 1 }

</bundles_post_ra>
